<compile_context>
chip_gen: v7x
topology: tpu7x:2x2x1
jax: 0.10.0
libtpu: 0.0.40
codegen_flags: <defaults>
</compile_context>

<pallas_src>
import jax
import jax.numpy as jnp
from jax.experimental import pallas as pl
from jax.experimental.pallas import tpu as pltpu

DTYPE = jnp.bfloat16


# ----------------------------- fused Pallas kernel -----------------------------

def _vision_tower_kernel(p_img_ref, p_dep_ref, lang_ref,
                         w_stack_ref, add_stack_ref, w_ada_ref, b_ada_ref,
                         o_ref):
    p_img = p_img_ref[0]                                                   # [N, pdim] bf16
    p_dep = p_dep_ref[0]                                                   # [N, pdim] bf16

    # ---- image patch embedding (cls/pos/bias folded into the additive table) ----
    img = jnp.dot(p_img, w_stack_ref[0],
                  preferred_element_type=jnp.float32) + add_stack_ref[0]   # [N, D] f32

    # ---- fuser folded into the patch-embedding weights (exact: linear chain) ----
    # fused = img@W1 + aux@W2 + b  ==  P_img@(W_patch@W1) + P_dep@(W_dp@W2) + add_fused
    fused = (jnp.dot(p_img, w_stack_ref[1], preferred_element_type=jnp.float32)
             + jnp.dot(p_dep, w_stack_ref[2], preferred_element_type=jnp.float32)
             + add_stack_ref[1])                                           # [N, D] f32

    # ---- AdaLN-Zero condition projection (per-batch, tiny, done in-register) ----
    lang = lang_ref[0].astype(jnp.float32)                                 # [1, Lc]
    cond = jax.nn.silu(lang).astype(w_ada_ref.dtype)
    shift = jnp.dot(cond, w_ada_ref[0], preferred_element_type=jnp.float32) + b_ada_ref[0]
    scale = jnp.dot(cond, w_ada_ref[1], preferred_element_type=jnp.float32) + b_ada_ref[1]
    gate = jnp.dot(cond, w_ada_ref[2], preferred_element_type=jnp.float32) + b_ada_ref[2]

    # ---- AdaLN-Zero modulation: gate * (LN(fused) * (1 + scale) + shift) ----
    # LayerNorm without affine, eps=1e-5, biased variance (matches nn.LayerNorm).
    mean = jnp.mean(fused, axis=-1, keepdims=True)
    var = jnp.mean(jnp.square(fused - mean), axis=-1, keepdims=True)
    normed = (fused - mean) * jax.lax.rsqrt(var + 1e-5)
    adjust = gate * (normed * (1.0 + scale) + shift)                       # [N, D] f32

    # ---- residual (n_aux=1 -> chunk-mean is identity; condition_dropout=0) ----
    o_ref[0] = (img + adjust).astype(o_ref.dtype)


def _resident(shape):
    # Constant index_map: block index never changes across the grid, so Pallas keeps
    # the block resident in VMEM (no re-DMA per grid step).
    return pl.BlockSpec(shape, lambda b, _n=len(shape): (0,) * _n)


def vision_tower_fused(p_img, p_dep, lang, w_stack, add_stack, w_ada, b_ada):
    B, N, pdim = p_img.shape
    D = w_stack.shape[-1]
    Lc = lang.shape[-1]
    return pl.pallas_call(
        _vision_tower_kernel,
        out_shape=jax.ShapeDtypeStruct((B, N, D), p_img.dtype),
        grid=(B,),
        in_specs=[
            pl.BlockSpec((1, N, pdim), lambda b: (b, 0, 0)),   # image patch rows
            pl.BlockSpec((1, N, pdim), lambda b: (b, 0, 0)),   # depth patch rows
            pl.BlockSpec((1, 1, Lc), lambda b: (b, 0, 0)),     # language embeds
            _resident(w_stack.shape),     # [3, pdim, D] stacked embed/fuser weights
            _resident(add_stack.shape),   # [2, N, D] additive tables (img / fused)
            _resident(w_ada.shape),       # [3, Lc, D] AdaLN weights (shift/scale/gate)
            _resident(b_ada.shape),       # [3, 1, D] AdaLN biases
        ],
        out_specs=pl.BlockSpec((1, N, D), lambda b: (b, 0, 0)),
        compiler_params=pltpu.CompilerParams(
            dimension_semantics=("parallel",),        # shard batches across v7x's 2 TCs
            vmem_limit_bytes=32 * 1024 * 1024),
    )(p_img, p_dep, lang, w_stack, add_stack, w_ada, b_ada)


# ----------------------------- VisionTower -----------------------------

class VisionTowerPallas:
    def __init__(self, key, *, in_channels=3, image_size=16, patch_size=4,
                 encoder_dim=32, depth_dim=24, language_dim=48):
        self.patch_size = patch_size
        self.num_patches = (image_size // patch_size) ** 2
        self.encoder_dim = encoder_dim
        self.n_auxiliary_features = 1         # depth only
        self.condition_dropout = 0.0
        self.use_clip = False

        keys = jax.random.split(key, 14)

        def init(k, shape, scale=0.02):
            return (jax.random.normal(k, shape, dtype=jnp.float32) * scale).astype(DTYPE)

        pdim = in_channels * patch_size * patch_size
        # stand-in VisionEncoder (patch embedding + cls + pos)
        # TODO(synk): real VisionEncoder/DepthEncoder transformer stacks
        # (hidden_states[vision_feature_layer]) are external HF models; only the
        # patch-embedding hot path is implemented here.
        self.w_patch = init(keys[0], (pdim, encoder_dim))
        self.b_patch = init(keys[1], (encoder_dim,))
        self.cls_tok = init(keys[2], (1, 1, encoder_dim))
        self.pos_emb = init(keys[3], (1, 1 + self.num_patches, encoder_dim))
        # stand-in DepthEncoder (patch embedding + cls + pos, different hidden dim)
        self.w_depth = init(keys[4], (pdim, depth_dim))
        self.b_depth = init(keys[5], (depth_dim,))
        self.cls_depth = init(keys[6], (1, 1, depth_dim))
        self.pos_depth = init(keys[7], (1, 1 + self.num_patches, depth_dim))
        # auxiliary_projectors[0] = nn.Linear(depth_hidden, encoder_hidden)
        self.w_proj = init(keys[8], (depth_dim, encoder_dim))
        self.b_proj = init(keys[9], (encoder_dim,))
        # fuser params (stand-in for FUSERS[model_params.fuser_id])
        # TODO(synk): FUSERS is an external registry; a per-auxiliary linear fuser
        # (img@W1 + aux@W2 + b) is used here.
        self.w_fuse_img = init(keys[10], (encoder_dim, encoder_dim))
        self.w_fuse_aux = init(keys[11], (encoder_dim, encoder_dim))
        self.b_fuse = init(keys[12], (encoder_dim,))
        # AdaLNZero: SiLU -> Linear(condition_dim, 3*hidden_dim) -> (shift, scale, gate)
        # (reference zero-inits this Linear; random kept here as a stand-in)
        self.w_ada = init(keys[13], (language_dim, 3 * encoder_dim))
        self.b_ada = jnp.zeros((3 * encoder_dim,), DTYPE)

        # ---- init-time folding (entire pre-LayerNorm path & token offsets are linear) ----
        f32 = jnp.float32
        D = encoder_dim
        w_patch32 = self.w_patch.astype(f32)
        w_proj32 = self.w_proj.astype(f32)
        w_dp32 = self.w_depth.astype(f32) @ w_proj32          # depth embed with projector folded
        w1 = self.w_fuse_img.astype(f32)
        w2 = self.w_fuse_aux.astype(f32)

        # per-token additive tables: row 0 = cls position (zero patch row), rows 1.. = patches
        pos = self.pos_emb[0].astype(f32)                                      # [N, D]
        add_img = pos + self.b_patch.astype(f32)[None, :]
        add_img = add_img.at[0].set(pos[0] + self.cls_tok[0, 0].astype(f32))   # f32 [N, D]

        posd = self.pos_depth[0].astype(f32)                                   # [N, Dd]
        pre = posd + self.b_depth.astype(f32)[None, :]
        pre = pre.at[0].set(posd[0] + self.cls_depth[0, 0].astype(f32))
        add_dep = pre @ w_proj32 + self.b_proj.astype(f32)[None, :]            # f32 [N, D]

        # fuser folded into the patch embeddings:
        #   fused = P_img @ (W_patch@W1) + P_dep @ (W_dp@W2) + (add_img@W1 + add_dep@W2 + b)
        add_fused = add_img @ w1 + add_dep @ w2 + self.b_fuse.astype(f32)[None, :]

        self.w_stack = jnp.stack([
            self.w_patch.astype(DTYPE),          # img embed
            (w_patch32 @ w1).astype(DTYPE),      # img -> fused contribution
            (w_dp32 @ w2).astype(DTYPE),         # depth -> fused contribution
        ], axis=0)                                                             # [3, pdim, D]
        self.add_stack = jnp.stack([add_img, add_fused], axis=0)               # f32 [2, N, D]

        # stacked AdaLN weights (leading-axis indexed in the kernel)
        self.w_ada_stack = jnp.transpose(
            self.w_ada.reshape(language_dim, 3, D), (1, 0, 2))                 # [3, Lc, D]
        self.b_ada_stack = self.b_ada.astype(f32).reshape(3, 1, D)             # f32 [3, 1, D]

    # Conv2d(kernel=P, stride=P) on NCHW == patchify + matmul; a zero row is prepended
    # at token 0 so the cls token can live in the additive table.
    # TODO(synk): at production image sizes, fold patch gathering into the kernel via an
    # index_map over (Hp, Wp) blocks (or use NHWC inputs) instead of this XLA transpose.
    def _patch_tokens(self, x_nchw):
        B, C, H, W = x_nchw.shape
        P = self.patch_size
        x = x_nchw.astype(DTYPE).reshape(B, C, H // P, P, W // P, P)
        x = x.transpose(0, 2, 4, 1, 3, 5)                    # [B, Hp, Wp, C, P, P]
        patches = x.reshape(B, (H // P) * (W // P), C * P * P)
        zero = jnp.zeros((B, 1, patches.shape[-1]), DTYPE)
        return jnp.concatenate([zero, patches], axis=1)      # [B, 1+Np, C*P*P]

    def forward(self, inputs):
        # conditional_fuser=True -> inputs = ((pixel_values, clip_inputs, depth_inputs), language_embeds)
        (pixel_values, _clip_inputs, depth_inputs), language_embeds = inputs
        if pixel_values is None:
            B = language_embeds.shape[0]
            return [jnp.zeros((B, 0, self.encoder_dim), language_embeds.dtype), None]

        p_img = self._patch_tokens(pixel_values)              # [B, N, pdim]
        p_dep = self._patch_tokens(depth_inputs)              # [B, N, pdim]
        B = p_img.shape[0]
        lang = language_embeds.astype(DTYPE).reshape(B, 1, -1)

        # Single fused kernel: embeds -> fuser -> AdaLN-Zero -> residual.
        out_feature = vision_tower_fused(
            p_img, p_dep, lang,
            self.w_stack, self.add_stack, self.w_ada_stack, self.b_ada_stack)

        # use_clip == False -> no _interpolate_feature / clip residual path
        return [out_feature, None]   # BaseModelOutputWithPooling.hidden_states


if __name__ == "__main__":
    key = jax.random.PRNGKey(0)
    k_param, k_pix, k_depth, k_lang = jax.random.split(key, 4)

    tower = VisionTowerPallas(k_param)

    pixel_values = jax.random.normal(k_pix, (2, 3, 16, 16), dtype=jnp.float32).astype(DTYPE)
    depth_inputs = jax.random.normal(k_depth, (2, 3, 16, 16), dtype=jnp.float32).astype(DTYPE)
    language_embeds = jax.random.normal(k_lang, (2, 48), dtype=jnp.float32).astype(DTYPE)

    hidden_states = tower.forward(((pixel_values, None, depth_inputs), language_embeds))
    out_feature = hidden_states[0]
    jax.block_until_ready(out_feature)

    assert out_feature.shape == (2, 17, 32), out_feature.shape
    assert out_feature.dtype == DTYPE
    assert bool(jnp.all(jnp.isfinite(out_feature.astype(jnp.float32))))
    print("KERNEL_OK")
</pallas_src>

<mosaic_0001>
module attributes {stable_mosaic.version = 11 : i64} {
  func.func @_vision_tower_kernel(%arg0: i32, %arg1: memref<1x17x48xbf16, #tpu.memory_space<vmem>>, %arg2: memref<1x17x48xbf16, #tpu.memory_space<vmem>>, %arg3: memref<1x1x48xbf16, #tpu.memory_space<vmem>>, %arg4: memref<3x48x32xbf16, #tpu.memory_space<vmem>>, %arg5: memref<2x17x32xf32, #tpu.memory_space<vmem>>, %arg6: memref<3x48x32xbf16, #tpu.memory_space<vmem>>, %arg7: memref<3x1x32xf32, #tpu.memory_space<vmem>>, %arg8: memref<1x17x32xbf16, #tpu.memory_space<vmem>>) attributes {dimension_semantics = [#tpu.dimension_semantics<parallel>], iteration_bounds = array<i64: 2>, scalar_prefetch = 0 : i64, scratch_operands = 0 : i64, tpu.core_type = #tpu.core_type<tc>, window_params = [{transform_indices = @transform_0, window_bounds = array<i64: 1, 17, 48>}, {transform_indices = @transform_1, window_bounds = array<i64: 1, 17, 48>}, {transform_indices = @transform_2, window_bounds = array<i64: 1, 1, 48>}, {pipeline_mode = #tpu.pipeline_mode<synchronous>, transform_indices = @transform_3, window_bounds = array<i64: 3, 48, 32>}, {pipeline_mode = #tpu.pipeline_mode<synchronous>, transform_indices = @transform_4, window_bounds = array<i64: 2, 17, 32>}, {pipeline_mode = #tpu.pipeline_mode<synchronous>, transform_indices = @transform_5, window_bounds = array<i64: 3, 48, 32>}, {pipeline_mode = #tpu.pipeline_mode<synchronous>, transform_indices = @transform_6, window_bounds = array<i64: 3, 1, 32>}, {transform_indices = @transform_7, window_bounds = array<i64: 1, 17, 32>}]} {
    %c0 = arith.constant 0 : index
    %c0_0 = arith.constant 0 : index
    %c0_1 = arith.constant 0 : index
    %0 = vector.load %arg1[%c0, %c0_0, %c0_1] : memref<1x17x48xbf16, #tpu.memory_space<vmem>>, vector<1x17x48xbf16>
    %1 = vector.shape_cast %0 : vector<1x17x48xbf16> to vector<17x48xbf16>
    %c0_2 = arith.constant 0 : index
    %c0_3 = arith.constant 0 : index
    %c0_4 = arith.constant 0 : index
    %2 = vector.load %arg2[%c0_2, %c0_3, %c0_4] : memref<1x17x48xbf16, #tpu.memory_space<vmem>>, vector<1x17x48xbf16>
    %3 = vector.shape_cast %2 : vector<1x17x48xbf16> to vector<17x48xbf16>
    %c0_5 = arith.constant 0 : index
    %c0_6 = arith.constant 0 : index
    %c0_7 = arith.constant 0 : index
    %4 = vector.load %arg4[%c0_5, %c0_6, %c0_7] : memref<3x48x32xbf16, #tpu.memory_space<vmem>>, vector<1x48x32xbf16>
    %5 = vector.shape_cast %4 : vector<1x48x32xbf16> to vector<48x32xbf16>
    %cst = arith.constant dense<0.000000e+00> : vector<17x32xf32>
    %6 = tpu.matmul %1, %5, %cst {dimension_numbers = #tpu.dot_dimension_numbers<[1], [0], [0], [1], [0, 0, 1, 1], [], []>} : vector<17x48xbf16>, vector<48x32xbf16>, vector<17x32xf32> -> vector<17x32xf32>
    %c0_8 = arith.constant 0 : index
    %c0_9 = arith.constant 0 : index
    %c0_10 = arith.constant 0 : index
    %7 = vector.load %arg5[%c0_8, %c0_9, %c0_10] : memref<2x17x32xf32, #tpu.memory_space<vmem>>, vector<1x17x32xf32>
    %8 = vector.shape_cast %7 : vector<1x17x32xf32> to vector<17x32xf32>
    %9 = arith.addf %6, %8 : vector<17x32xf32>
    %c1 = arith.constant 1 : index
    %c0_11 = arith.constant 0 : index
    %c0_12 = arith.constant 0 : index
    %10 = vector.load %arg4[%c1, %c0_11, %c0_12] : memref<3x48x32xbf16, #tpu.memory_space<vmem>>, vector<1x48x32xbf16>
    %11 = vector.shape_cast %10 : vector<1x48x32xbf16> to vector<48x32xbf16>
    %cst_13 = arith.constant dense<0.000000e+00> : vector<17x32xf32>
    %12 = tpu.matmul %1, %11, %cst_13 {dimension_numbers = #tpu.dot_dimension_numbers<[1], [0], [0], [1], [0, 0, 1, 1], [], []>} : vector<17x48xbf16>, vector<48x32xbf16>, vector<17x32xf32> -> vector<17x32xf32>
    %c2 = arith.constant 2 : index
    %c0_14 = arith.constant 0 : index
    %c0_15 = arith.constant 0 : index
    %13 = vector.load %arg4[%c2, %c0_14, %c0_15] : memref<3x48x32xbf16, #tpu.memory_space<vmem>>, vector<1x48x32xbf16>
    %14 = vector.shape_cast %13 : vector<1x48x32xbf16> to vector<48x32xbf16>
    %cst_16 = arith.constant dense<0.000000e+00> : vector<17x32xf32>
    %15 = tpu.matmul %3, %14, %cst_16 {dimension_numbers = #tpu.dot_dimension_numbers<[1], [0], [0], [1], [0, 0, 1, 1], [], []>} : vector<17x48xbf16>, vector<48x32xbf16>, vector<17x32xf32> -> vector<17x32xf32>
    %16 = arith.addf %12, %15 : vector<17x32xf32>
    %c1_17 = arith.constant 1 : index
    %c0_18 = arith.constant 0 : index
    %c0_19 = arith.constant 0 : index
    %17 = vector.load %arg5[%c1_17, %c0_18, %c0_19] : memref<2x17x32xf32, #tpu.memory_space<vmem>>, vector<1x17x32xf32>
    %18 = vector.shape_cast %17 : vector<1x17x32xf32> to vector<17x32xf32>
    %19 = arith.addf %16, %18 : vector<17x32xf32>
    %c0_20 = arith.constant 0 : index
    %c0_21 = arith.constant 0 : index
    %c0_22 = arith.constant 0 : index
    %20 = vector.load %arg3[%c0_20, %c0_21, %c0_22] : memref<1x1x48xbf16, #tpu.memory_space<vmem>>, vector<1x1x48xbf16>
    %21 = vector.shape_cast %20 : vector<1x1x48xbf16> to vector<1x48xbf16>
    %22 = arith.extf %21 : vector<1x48xbf16> to vector<1x48xf32>
    %23 = arith.negf %22 : vector<1x48xf32>
    %24 = math.exp %23 : vector<1x48xf32>
    %cst_23 = arith.constant 1.000000e+00 : f32
    %25 = vector.broadcast %cst_23 : f32 to vector<1x48xf32>
    %26 = arith.addf %25, %24 : vector<1x48xf32>
    %27 = arith.divf %25, %26 : vector<1x48xf32>
    %28 = arith.mulf %22, %27 : vector<1x48xf32>
    %29 = arith.truncf %28 : vector<1x48xf32> to vector<1x48xbf16>
    %c0_24 = arith.constant 0 : index
    %c0_25 = arith.constant 0 : index
    %c0_26 = arith.constant 0 : index
    %30 = vector.load %arg6[%c0_24, %c0_25, %c0_26] : memref<3x48x32xbf16, #tpu.memory_space<vmem>>, vector<1x48x32xbf16>
    %31 = vector.shape_cast %30 : vector<1x48x32xbf16> to vector<48x32xbf16>
    %cst_27 = arith.constant dense<0.000000e+00> : vector<1x32xf32>
    %32 = tpu.matmul %29, %31, %cst_27 {dimension_numbers = #tpu.dot_dimension_numbers<[1], [0], [0], [1], [0, 0, 1, 1], [], []>} : vector<1x48xbf16>, vector<48x32xbf16>, vector<1x32xf32> -> vector<1x32xf32>
    %c0_28 = arith.constant 0 : index
    %c0_29 = arith.constant 0 : index
    %c0_30 = arith.constant 0 : index
    %33 = vector.load %arg7[%c0_28, %c0_29, %c0_30] : memref<3x1x32xf32, #tpu.memory_space<vmem>>, vector<1x1x32xf32>
    %34 = vector.shape_cast %33 : vector<1x1x32xf32> to vector<1x32xf32>
    %35 = arith.addf %32, %34 : vector<1x32xf32>
    %c1_31 = arith.constant 1 : index
    %c0_32 = arith.constant 0 : index
    %c0_33 = arith.constant 0 : index
    %36 = vector.load %arg6[%c1_31, %c0_32, %c0_33] : memref<3x48x32xbf16, #tpu.memory_space<vmem>>, vector<1x48x32xbf16>
    %37 = vector.shape_cast %36 : vector<1x48x32xbf16> to vector<48x32xbf16>
    %cst_34 = arith.constant dense<0.000000e+00> : vector<1x32xf32>
    %38 = tpu.matmul %29, %37, %cst_34 {dimension_numbers = #tpu.dot_dimension_numbers<[1], [0], [0], [1], [0, 0, 1, 1], [], []>} : vector<1x48xbf16>, vector<48x32xbf16>, vector<1x32xf32> -> vector<1x32xf32>
    %c1_35 = arith.constant 1 : index
    %c0_36 = arith.constant 0 : index
    %c0_37 = arith.constant 0 : index
    %39 = vector.load %arg7[%c1_35, %c0_36, %c0_37] : memref<3x1x32xf32, #tpu.memory_space<vmem>>, vector<1x1x32xf32>
    %40 = vector.shape_cast %39 : vector<1x1x32xf32> to vector<1x32xf32>
    %41 = arith.addf %38, %40 : vector<1x32xf32>
    %c2_38 = arith.constant 2 : index
    %c0_39 = arith.constant 0 : index
    %c0_40 = arith.constant 0 : index
    %42 = vector.load %arg6[%c2_38, %c0_39, %c0_40] : memref<3x48x32xbf16, #tpu.memory_space<vmem>>, vector<1x48x32xbf16>
    %43 = vector.shape_cast %42 : vector<1x48x32xbf16> to vector<48x32xbf16>
    %cst_41 = arith.constant dense<0.000000e+00> : vector<1x32xf32>
    %44 = tpu.matmul %29, %43, %cst_41 {dimension_numbers = #tpu.dot_dimension_numbers<[1], [0], [0], [1], [0, 0, 1, 1], [], []>} : vector<1x48xbf16>, vector<48x32xbf16>, vector<1x32xf32> -> vector<1x32xf32>
    %c2_42 = arith.constant 2 : index
    %c0_43 = arith.constant 0 : index
    %c0_44 = arith.constant 0 : index
    %45 = vector.load %arg7[%c2_42, %c0_43, %c0_44] : memref<3x1x32xf32, #tpu.memory_space<vmem>>, vector<1x1x32xf32>
    %46 = vector.shape_cast %45 : vector<1x1x32xf32> to vector<1x32xf32>
    %47 = arith.addf %44, %46 : vector<1x32xf32>
    %cst_45 = arith.constant dense<0.000000e+00> : vector<17xf32>
    %48 = vector.multi_reduction <add>, %19, %cst_45 [1] : vector<17x32xf32> to vector<17xf32>
    %49 = vector.shape_cast %48 : vector<17xf32> to vector<17x1xf32>
    %cst_46 = arith.constant 3.200000e+01 : f32
    %50 = vector.broadcast %cst_46 : f32 to vector<17x1xf32>
    %51 = arith.divf %49, %50 : vector<17x1xf32>
    %52 = vector.broadcast %51 : vector<17x1xf32> to vector<17x32xf32>
    %53 = arith.subf %19, %52 : vector<17x32xf32>
    %54 = arith.mulf %53, %53 : vector<17x32xf32>
    %cst_47 = arith.constant dense<0.000000e+00> : vector<17xf32>
    %55 = vector.multi_reduction <add>, %54, %cst_47 [1] : vector<17x32xf32> to vector<17xf32>
    %56 = vector.shape_cast %55 : vector<17xf32> to vector<17x1xf32>
    %cst_48 = arith.constant 3.200000e+01 : f32
    %57 = vector.broadcast %cst_48 : f32 to vector<17x1xf32>
    %58 = arith.divf %56, %57 : vector<17x1xf32>
    %59 = vector.broadcast %51 : vector<17x1xf32> to vector<17x32xf32>
    %60 = arith.subf %19, %59 : vector<17x32xf32>
    %cst_49 = arith.constant 9.99999974E-6 : f32
    %61 = vector.broadcast %cst_49 : f32 to vector<17x1xf32>
    %62 = arith.addf %58, %61 : vector<17x1xf32>
    %63 = math.rsqrt %62 : vector<17x1xf32>
    %64 = vector.broadcast %63 : vector<17x1xf32> to vector<17x32xf32>
    %65 = arith.mulf %60, %64 : vector<17x32xf32>
    %cst_50 = arith.constant 1.000000e+00 : f32
    %66 = vector.broadcast %cst_50 : f32 to vector<1x32xf32>
    %67 = arith.addf %66, %41 : vector<1x32xf32>
    %68 = vector.broadcast %67 : vector<1x32xf32> to vector<17x32xf32>
    %69 = arith.mulf %65, %68 : vector<17x32xf32>
    %70 = vector.broadcast %35 : vector<1x32xf32> to vector<17x32xf32>
    %71 = arith.addf %69, %70 : vector<17x32xf32>
    %72 = vector.broadcast %47 : vector<1x32xf32> to vector<17x32xf32>
    %73 = arith.mulf %72, %71 : vector<17x32xf32>
    %74 = arith.addf %9, %73 : vector<17x32xf32>
    %75 = arith.truncf %74 : vector<17x32xf32> to vector<17x32xbf16>
    %c0_51 = arith.constant 0 : index
    %c0_52 = arith.constant 0 : index
    %c0_53 = arith.constant 0 : index
    %76 = vector.load %arg8[%c0_51, %c0_52, %c0_53] : memref<1x17x32xbf16, #tpu.memory_space<vmem>>, vector<1x17x32xbf16>
    %77 = vector.shape_cast %76 : vector<1x17x32xbf16> to vector<17x32xbf16>
    %78 = vector.shape_cast %75 : vector<17x32xbf16> to vector<1x17x32xbf16>
    tpu.vector_store %arg8[%c0_51, %c0_52, %c0_53], %78 {strides = array<i32>} : memref<1x17x32xbf16, #tpu.memory_space<vmem>>, vector<1x17x32xbf16>,
    return
  }
  func.func @transform_0(%arg0: i32) -> (i32, i32, i32) {
    %c0_i32 = arith.constant 0 : i32
    %c0_i32_0 = arith.constant 0 : i32
    %c0_i32_1 = arith.constant 0 : i32
    return %arg0, %c0_i32, %c0_i32_0 : i32, i32, i32
  }
  func.func @transform_1(%arg0: i32) -> (i32, i32, i32) {
    %c0_i32 = arith.constant 0 : i32
    %c0_i32_0 = arith.constant 0 : i32
    %c0_i32_1 = arith.constant 0 : i32
    return %arg0, %c0_i32, %c0_i32_0 : i32, i32, i32
  }
  func.func @transform_2(%arg0: i32) -> (i32, i32, i32) {
    %c0_i32 = arith.constant 0 : i32
    %c0_i32_0 = arith.constant 0 : i32
    %c0_i32_1 = arith.constant 0 : i32
    return %arg0, %c0_i32, %c0_i32_0 : i32, i32, i32
  }
  func.func @transform_3(%arg0: i32) -> (i32, i32, i32) {
    %c0_i32 = arith.constant 0 : i32
    %c0_i32_0 = arith.constant 0 : i32
    %c0_i32_1 = arith.constant 0 : i32
    %c0_i32_2 = arith.constant 0 : i32
    return %c0_i32, %c0_i32_0, %c0_i32_1 : i32, i32, i32
  }
  func.func @transform_4(%arg0: i32) -> (i32, i32, i32) {
    %c0_i32 = arith.constant 0 : i32
    %c0_i32_0 = arith.constant 0 : i32
    %c0_i32_1 = arith.constant 0 : i32
    %c0_i32_2 = arith.constant 0 : i32
    return %c0_i32, %c0_i32_0, %c0_i32_1 : i32, i32, i32
  }
  func.func @transform_5(%arg0: i32) -> (i32, i32, i32) {
    %c0_i32 = arith.constant 0 : i32
    %c0_i32_0 = arith.constant 0 : i32
    %c0_i32_1 = arith.constant 0 : i32
    %c0_i32_2 = arith.constant 0 : i32
    return %c0_i32, %c0_i32_0, %c0_i32_1 : i32, i32, i32
  }
  func.func @transform_6(%arg0: i32) -> (i32, i32, i32) {
    %c0_i32 = arith.constant 0 : i32
    %c0_i32_0 = arith.constant 0 : i32
    %c0_i32_1 = arith.constant 0 : i32
    %c0_i32_2 = arith.constant 0 : i32
    return %c0_i32, %c0_i32_0, %c0_i32_1 : i32, i32, i32
  }
  func.func @transform_7(%arg0: i32) -> (i32, i32, i32) {
    %c0_i32 = arith.constant 0 : i32
    %c0_i32_0 = arith.constant 0 : i32
    %c0_i32_1 = arith.constant 0 : i32
    return %arg0, %c0_i32, %c0_i32_0 : i32, i32, i32
  }
}

</mosaic_0001>

<bundles_post_ra>
// kernel: tpu_custom_call.1
= control target key start
LH: loop header
LB: loop body
LE: loop exit
PB: predicated region body
PF: predicated region fallthrough
CT: control target
= control target key end

     0   :  { %s1211_s24 = smov 0   ;;  %s1352_s0 = inlined_call_operand.vmem [shape: bf16[2,17,48], index: 0, kind: input, shape index: {}]   ;;  %s1353_s1 = inlined_call_operand.vmem [shape: bf16[2,17,48], index: 1, kind: input, shape index: {}]   ;;  %s1354_s2 = inlined_call_operand.vmem [shape: bf16[2,1,48], index: 2, kind: input, shape index: {}]   ;;  %s1355_s3 = inlined_call_operand.vmem [shape: bf16[3,48,32], index: 3, kind: input, shape index: {}]   ;;  %s1356_s4 = inlined_call_operand.vmem [shape: f32[2,17,32], index: 4, kind: input, shape index: {}]   ;;  %s1357_s5 = inlined_call_operand.vmem [shape: bf16[3,48,32], index: 5, kind: input, shape index: {}]   ;;  %s1358_s6 = inlined_call_operand.vmem [shape: f32[3,1,32], index: 6, kind: input, shape index: {}]   ;;  %s1359_s7 = inlined_call_operand.vmem [shape: bf16[2,17,32], index: 7, kind: output, shape index: {}]  }
   0x1 LB: > { %s954_s25 = sadd.s32 4294967295, %s1167_s24   ;;  %p958_p0 = scmp.ge.s32.totalorder %s1167_s24, 1  ;;  %s1167_s24 = sphi %s1211_s24, %s17_s24  }
   0x2   : > { %p255_p1 = scmp.lt.s32.totalorder %s1167_s24, 3 }
   0x4   : > { %p256_p2 = pnand %p958_p0, %p255_p1 }
   0x5   : > { %v1129_v0 = vld [vmem:[%s1355_s3] sm:$0xff] (!%p256_p2)   ;;  %p295_p3 = scmp.lt.s32.totalorder (!%p256_p2), %s954_s25, 1  ;;  %v1130_v1 = vld [vmem:[%s1355_s3 + $0x8] sm:$0xff] (!%p256_p2)   ;;  %v1132_v2 = vld [vmem:[%s1355_s3 + $0x30] sm:$0xff] (!%p256_p2)   ;;  %vm355_vm0 = vcmask (!%p256_p2), 392192   ;;  %v1169_v20 = vmov (!%p256_p2), 0.0  }
   0x6   : > { %259 = sbr.rel (%p256_p2) target bundleno = 572 (0x23c), region = 48  ;;  %1058 = vmatprep.subr.bf16.mxu0 (!%p256_p2), %v1129_v0  ;;  %v1131_v3 = vld [vmem:[%s1355_s3 + $0x10] sm:$0xff] (!%p256_p2)   ;;  %1068 = vmatprep.subr.bf16.mxu1 (!%p256_p2), %v1132_v2  ;;  %v1136_v4 = vld [vmem:[%s1355_s3 + $0x38] sm:$0xff] (!%p256_p2)   ;;  %v1138_v8 = vld [vmem:[%s1355_s3 + $0x40] sm:$0xff] (!%p256_p2)   ;;  %vm1170_vm1 = vmmov (!%p256_p2), 0   ;;  %vm796_vm2 = vcmask (!%p256_p2), 253952  }
   0x7   : > { %1059 = vmatpush3.bf16.msra.mxu0 (!%p256_p2), %v1129_v0  ;;  %1069 = vmatpush3.bf16.msra.mxu1 (!%p256_p2), %v1132_v2  ;;  %v1135_v7 = vld [vmem:[%s1355_s3 + $0x18] sm:$0xff] (!%p256_p2)   ;;  %v1137_v11 = vld [vmem:[%s1355_s3 + $0x20] sm:$0xff] (!%p256_p2)   ;;  %v1141_v12 = vld [vmem:[%s1355_s3 + $0x28] sm:$0xff] (!%p256_p2)   ;;  %vm789_vm3 = vcmask (!%p256_p2), 261120   ;;  %vm873_vm4 = vsmask.f32 (!%p256_p2), 256 }
   0x8   : > { %1060 = vmatprep.subr.bf16.mxu0 (!%p256_p2), %v1130_v1  ;;  %1070 = vmatprep.subr.bf16.mxu1 (!%p256_p2), %v1136_v4  ;;  %v1142_v18 = vld [vmem:[%s1357_s5] sm:$0xff] (!%p256_p2)   ;;  %v1144_v19 = vld [vmem:[%s1357_s5 + $0x18] sm:$0xff] (!%p256_p2)   ;;  %v1143_v22 = vld [vmem:[%s1357_s5 + $0x8] sm:$0xff] (!%p256_p2)   ;;  %vm869_vm6 = vcmask (!%p256_p2), 257024  }
   0x9   : > { %v1146_v23 = vld [vmem:[%s1357_s5 + $0x20] sm:$0xff] (!%p256_p2)   ;;  %v1145_v25 = vld [vmem:[%s1357_s5 + $0x10] sm:$0xff] (!%p256_p2)   ;;  %v1148_v26 = vld [vmem:[%s1357_s5 + $0x28] sm:$0xff] (!%p256_p2)  }
   0xa   : > { %v1147_v28 = vld [vmem:[%s1357_s5 + $0x30] sm:$0xff] (!%p256_p2)   ;;  %v1149_v29 = vld [vmem:[%s1357_s5 + $0x38] sm:$0xff] (!%p256_p2)   ;;  %v1150_v30 = vld [vmem:[%s1357_s5 + $0x40] sm:$0xff] (!%p256_p2)  }
   0xb   : > { %1061 = vmatpush3.bf16.msra.mxu0 (!%p256_p2), %v1130_v1  ;;  %1071 = vmatpush3.bf16.msra.mxu1 (!%p256_p2), %v1136_v4  ;;  %v995_v40 = vld [vmem:[%s1356_s4 + $0x28] sm:$0x1] (!%p256_p2)  ;;  %v993_v45 = vld [vmem:[%s1356_s4 + $0x18] sm:$0xff] (!%p256_p2)  ;;  %v994_v48 = vld [vmem:[%s1356_s4 + $0x20] sm:$0xff] (!%p256_p2) }
   0xc   : > { %1062 = vmatprep.subr.bf16.mxu0 (!%p256_p2), %v1131_v3  ;;  %1072 = vmatprep.subr.bf16.mxu1 (!%p256_p2), %v1138_v8  ;;  %vm874_vm5 = vmand (!%p256_p2), %vm796_vm2, %vm873_vm4 }
   0xd   : > { %s1361_s25 = smov (!%p295_p3, %s954_s25), 1 }
   0xe   : > { %s1234_s11 = smul.u32 12, %s1361_s25  ;;  %s307_s9 = scalar_lea.vmem %s1354_s2, %s1361_s25 }
   0xf   : > { %1063 = vmatpush3.bf16.msra.mxu0 %v1131_v3  ;;  %1073 = vmatpush3.bf16.msra.mxu1 %v1138_v8  ;;  %v577_v13 = vld [vmem:[%s307_s9] sm:$0x1] }
  0x10   : > { %s299_s14 = scalar_lea.vmem %s1352_s0, %s1234_s11  ;;  %s304_s21 = scalar_lea.vmem %s1353_s1, %s1234_s11  ;;  %1078 = vmatprep.subr.bf16.mxu0 %v1135_v7  ;;  %v578_v14 = vunpack.c.l.bf16 %v577_v13  ;;  %1088 = vmatprep.subr.bf16.mxu1 %v1169_v20 }
  0x11   : > { %v1133_v5 = vld [vmem:[%s299_s14] sm:$0xff]   ;;  %v1134_v6 = vld [vmem:[%s299_s14 + $0x8] ss:$0 sps:$4 sm:$0x11]   ;;  %s312_s23 = scalar_lea.vmem %s1359_s7, %s1234_s11 }
  0x12   : > { %1064 = vmatprep.mubr.msk.bf16.mxu0 %vm355_vm0, %v1133_v5  ;;  %v1139_v9 = vld [vmem:[%s304_s21] sm:$0xff]   ;;  %v1140_v10 = vld [vmem:[%s304_s21 + $0x8] ss:$0 sps:$4 sm:$0x11]   ;;  %v996_v15 = vmul.f32 -1.442695, %v578_v14 }
  0x13   : > { %1074 = vmatprep.mubr.msk.bf16.mxu1 %vm355_vm0, %v1139_v9  ;;  %1065 = vmatmul.mubr.msk.bf16.vlgmr.msra.gmra.mrb[0].mxu0 %vm355_vm0, %v1134_v6 }
  0x14   : > { %1079 = vmatpush3.bf16.msra.mxu0 %v1135_v7  ;;  %1084 = vmatprep.mubr.msk.bf16.mxu0 %vm355_vm0, %v1133_v5  ;;  %1151 = vpow2.f32 %v996_v15 }
  0x15   : > { %1080 = vmatprep.subr.bf16.mxu0 %v1137_v11  ;;  %1075 = vmatmul.mubr.msk.bf16.vlgmr.msra.gmra.mrb[0].mxu1 %vm355_vm0, %v1140_v10 }
  0x16   : > { %1089 = vmatpush3.bf16.msra.mxu1 %v1142_v18  ;;  %1094 = vmatprep.mubr.msk.bf16.mxu1 %vm1170_vm1, %v1169_v20 }
  0x17   : > { %1090 = vmatprep.subr.bf16.mxu1 %v1169_v20 }
  0x18   : > { %1081 = vmatpush3.bf16.msra.mxu0 %v1137_v11 }
  0x19   : > { %1082 = vmatprep.subr.bf16.mxu0 %v1141_v12 }
  0x1a   : > { %1091 = vmatpush3.bf16.msra.mxu1 %v1143_v22 }
  0x1b   : > { %1092 = vmatprep.subr.bf16.mxu1 %v1169_v20 }
  0x1c   : > { %1083 = vmatpush3.bf16.msra.mxu0 %v1141_v12 }
  0x1d   : > { %1098 = vmatprep.subr.bf16.mxu0 %v1169_v20 }
  0x1e   : > { %v1152_v16 = vpop.eup %1151  ;;  %1093 = vmatpush3.bf16.msra.mxu1 %v1145_v25 }
  0x1f   : > { %1085 = vmatmul.mubr.msk.bf16.vlgmr.msra.gmra.mrb[4].mxu0 %vm355_vm0, %v1134_v6  ;;  %v582_v17 = vadd.f32 1.0, %v1152_v16  ;;  %1108 = vmatprep.subr.bf16.mxu1 %v1169_v20 }
  0x20   : > { %1099 = vmatpush3.bf16.msra.mxu0 %v1144_v19  ;;  %1104 = vmatprep.mubr.msk.bf16.mxu0 %vm1170_vm1, %v1169_v20 }
  0x21   : > { %1153 = vrcp.f32 %v582_v17  ;;  %1100 = vmatprep.subr.bf16.mxu0 %v1169_v20 }
  0x24   : > { %1101 = vmatpush3.bf16.msra.mxu0 %v1146_v23 }
  0x25   : > { %1102 = vmatprep.subr.bf16.mxu0 %v1169_v20 }
  0x28   : > { %1103 = vmatpush3.bf16.msra.mxu0 %v1148_v26 }
  0x2b   : > { %v1154_v21 = vpop.eup %1153 }
  0x2c   : > { %v585_v24 = vmul.f32 %v1154_v21, %v578_v14  ;;  %v1007_v21 = vld [vmem:[%s1358_s6 + $0x1] sm:$0x1] }
  0x2e   : > { %v586_v27 = vpack.c.bf16 %v585_v24, %v585_v24  ;;  %v832_v24 = vlaneseq }
  0x30   : > { %1095 = vmatmul.mubr.msk.bf16.vlgmr.msra.gmra.mrb[4].mxu1 %vm355_vm0, %v586_v27  ;;  %1105 = vmatmul.mubr.msk.bf16.vlgmr.msra.gmra.mrb[8].mxu0 %vm355_vm0, %v586_v27 }
  0x31   : > { %1109 = vmatpush3.bf16.msra.mxu1 %v1147_v28  ;;  %1114 = vmatprep.mubr.msk.bf16.mxu1 %vm1170_vm1, %v1169_v20 }
  0x32   : > { %1110 = vmatprep.subr.bf16.mxu1 %v1169_v20 }
  0x35   : > { %1111 = vmatpush3.bf16.msra.mxu1 %v1149_v29 }
  0x36   : > { %1112 = vmatprep.subr.bf16.mxu1 %v1169_v20 }
  0x39   : > { %1113 = vmatpush3.bf16.msra.mxu1 %v1150_v30  ;;  %v833_v30 = vshrl.u32 %v832_v24, 7 }
  0x3c   : > { %1115 = vmatmul.mubr.msk.bf16.vlgmr.msra.gmra.mrb[8].mxu1 %vm355_vm0, %v586_v27 }
  0xe6   : > { %v1302_v31 = vpop.f32.mrb[0].mxu0 }
  0xe7   : > { %v1304_v32 = vpop.f32.mrb[1].mxu0 }
  0xe8   : > { %v1067_v33 = vpop.f32.mrb[2].mxu0  ;;  %v1076_v35 = vpop.f32.mrb[0].mxu1 }
  0xe9   : > { %v1306_v34 = vpop.f32.mrb[3].mxu0  ;;  %v490_v36 = vpop.f32.mrb[1].mxu1 }
  0xea   : > { %v1077_v37 = vpop.f32.mrb[2].mxu1 }
  0xeb   : > { %v493_v38 = vpop.f32.mrb[3].mxu1  ;;  %v834_v37 = vsub.s32 0, %v833_v30 }
  0xf2   : > { %v1086_v39 = vpop.f32.mrb[4].mxu0 }
  0xf3   : > { %v565_v41 = vadd.f32 %v1086_v39, %v1076_v35  ;;  %v556_v42 = vpop.f32.mrb[5].mxu0  ;;  %v593_v35 = vld [vmem:[%s1358_s6] sm:$0x1] }
  0xf4   : > { %v557_v43 = vadd.f32 %v556_v42, %v490_v36  ;;  %v1087_v44 = vpop.f32.mrb[6].mxu0  ;;  %v1018_v36 = vld [vmem:[%s1358_s6 + $0x2] sm:$0x1] }
  0xf5   : > { %v559_v46 = vpop.f32.mrb[7].mxu0  ;;  %v576_v47 = vadd.f32 %v995_v40, %v565_v41 }
  0xf6   : > { %v560_v49 = vadd.f32 %v559_v46, %v493_v38  ;;  %v574_v51 = vadd.f32 %v993_v45, %v557_v43 }
  0xf7   : > { %v797_v50 = vsel %vm796_vm2, %v576_v47, 0.0 }
  0xf8   : > { %798 = vadd.xlane.f32.xlu0 %v797_v50  ;;  %v575_v52 = vadd.f32 %v994_v48, %v560_v49  ;;  %v790_v54 = vsel %vm789_vm3, %v574_v51, 0.0 }
  0xfa   : > { %v793_v53 = vsel %vm789_vm3, %v575_v52, 0.0 }
  0xfb   : > { %794 = vadd.xlane.f32.xlu1 %v793_v53 }
  0xfc   : > { %791 = vadd.xlane.f32.xlu0 %v790_v54 }
 0x103   : > { %v649_v6 = vpop.f32.mrb[4].mxu1  ;;  %v716_v10 = vpop.f32.mrb[8].mxu0 }
 0x104   : > { %v1096_v7 = vpop.f32.mrb[5].mxu1  ;;  %v1106_v11 = vpop.f32.mrb[9].mxu0  ;;  %v717_v27 = vadd.f32 %v1007_v21, %v716_v10  ;;  %v650_v38 = vadd.f32 %v649_v6, %v593_v35 }
 0x105   : > { %v652_v8 = vpop.f32.mrb[6].mxu1  ;;  %v719_v12 = vpop.f32.mrb[10].mxu0 }
 0x106   : > { %v1097_v9 = vpop.f32.mrb[7].mxu1  ;;  %v1107_v13 = vpop.f32.mrb[11].mxu0  ;;  %v831_v33 = vadd.f32 1.0, %v717_v27  ;;  %v842_v43 = vrot.slane %v650_v38, %v834_v37 }
 0x108   : > { %v835_v39 = vrot.slane %v831_v33, %v834_v37 }
 0x10f   : > { %v783_v14 = vpop.f32.mrb[8].mxu1 }
 0x110   : > { %v1116_v15 = vpop.f32.mrb[9].mxu1  ;;  %v784_v40 = vadd.f32 %v1018_v36, %v783_v14 }
 0x111   : > { %v786_v16 = vpop.f32.mrb[10].mxu1 }
 0x112   : > { %v1117_v17 = vpop.f32.mrb[11].mxu1  ;;  %v849_v45 = vrot.slane %v784_v40, %v834_v37 }
 0x185   : > { %v799_v55 = vpop.xlane.xlu0 %798 }
 0x186   : > { %v803_v56 = vmul.f32 0.03125, %v799_v55  ;;  %v327_v55 = vld [vmem:[%s1356_s4 + $0x8] sm:$0xff] }
 0x188   : > { %v806_v57 = vsub.f32 %v576_v47, %v803_v56  ;;  %v795_v58 = vpop.xlane.xlu1 %794  ;;  %v328_v47 = vld [vmem:[%s1356_s4 + $0x10] sm:$0x1] }
 0x189   : > { %v802_v59 = vmul.f32 0.03125, %v795_v58  ;;  %v792_v60 = vpop.xlane.xlu0 %791 }
 0x18a   : > { %v801_v61 = vmul.f32 0.03125, %v792_v60  ;;  %v809_v62 = vmul.f32 %v806_v57, %v806_v57 }
 0x18b   : > { %v805_v63 = vsub.f32 %v575_v52, %v802_v59  ;;  %v405_v52 = vadd.f32 %v1302_v31, %v328_v47  ;;  %v400_v31 = vadd.f32 %v1306_v34, %v327_v55 }
 0x18c   : > { %v804_v0 = vsub.f32 %v574_v51, %v801_v61  ;;  %v816_v1 = vsel %vm796_vm2, %v809_v62, 0.0  ;;  %v875_v61 = vld [vmem:[%s312_s23 + $0x8] sm:$0x1] }
 0x18d   : > { %817 = vadd.xlane.f32.xlu1 %v816_v1  ;;  %v808_v2 = vmul.f32 %v805_v63, %v805_v63 }
 0x18e   : > { %v807_v3 = vmul.f32 %v804_v0, %v804_v0 }
 0x18f   : > { %v813_v4 = vsel %vm789_vm3, %v808_v2, 0.0 }
 0x190   : > { %v810_v5 = vsel %vm789_vm3, %v807_v3, 0.0 }
 0x191   : > { %814 = vadd.xlane.f32.xlu1 %v813_v4  ;;  %811 = vadd.xlane.f32.xlu0 %v810_v5 }
 0x21a   : > { %v818_v18 = vpop.xlane.xlu1 %817 }
 0x21b   : > { %v821_v19 = vmul.f32 0.03125, %v818_v18 }
 0x21d   : > { %v824_v20 = vadd.f32 1e-05, %v821_v19 }
 0x21e   : > { %v815_v22 = vpop.xlane.xlu1 %814  ;;  %v812_v23 = vpop.xlane.xlu0 %811 }
 0x21f   : > { %1155 = vrsqrt.f32 %v824_v20  ;;  %v820_v25 = vmul.f32 0.03125, %v815_v22  ;;  %v819_v26 = vmul.f32 0.03125, %v812_v23 }
 0x221   : > { %v823_v28 = vadd.f32 1e-05, %v820_v25  ;;  %v822_v29 = vadd.f32 1e-05, %v819_v26 }
 0x223   : > { %1157 = vrsqrt.f32 %v823_v28 }
 0x224   : > { %1159 = vrsqrt.f32 %v822_v29 }
 0x229   : > { %v1156_v41 = vpop.eup %1155 }
 0x22a   : > { %v830_v42 = vmul.f32 %v1156_v41, %v806_v57  ;;  %v326_v57 = vld [vmem:[%s1356_s4] sm:$0xff] }
 0x22c   : > { %v838_v44 = vmul.f32 %v835_v39, %v830_v42 }
 0x22d   : > { %v1158_v46 = vpop.eup %1157 }
 0x22e   : > { %v1160_v48 = vpop.eup %1159  ;;  %v829_v49 = vmul.f32 %v1158_v46, %v805_v63  ;;  %v845_v50 = vadd.f32 %v842_v43, %v838_v44 }
 0x22f   : > { %v828_v51 = vmul.f32 %v1160_v48, %v804_v0  ;;  %v397_v0 = vadd.f32 %v1304_v32, %v326_v57 }
 0x230   : > { %v837_v53 = vmul.f32 %v835_v39, %v829_v49  ;;  %v852_v54 = vmul.f32 %v849_v45, %v845_v50 }
 0x231   : > { %v836_v56 = vmul.f32 %v835_v39, %v828_v51 }
 0x232   : > { %v844_v58 = vadd.f32 %v842_v43, %v837_v53  ;;  %v855_v59 = vadd.f32 %v852_v54, %v405_v52 }
 0x233   : > { %v843_v60 = vadd.f32 %v842_v43, %v836_v56 }
 0x234   : > { %v851_v62 = vmul.f32 %v849_v45, %v844_v58  ;;  %v1030_v63 = vpack.c.bf16 %v855_v59, %v855_v59 }
 0x235   : > { %v850_v1 = vmul.f32 %v849_v45, %v843_v60 }
 0x236   : > { %v854_v2 = vadd.f32 %v851_v62, %v400_v31  ;;  %v876_v3 = vsel %vm874_vm5, %v1030_v63, %v875_v61 }
 0x237   : > { %v853_v4 = vadd.f32 %v850_v1, %v397_v0  ;;  %877 = vst [vmem:[%s312_s23 + $0x8] sm:$0x1] %v876_v3 }
 0x238   : > { %v1029_v5 = vpack.c.bf16 %v854_v2, %v854_v2 }
 0x239   : > { %v1028_v6 = vpack.c.bf16 %v853_v4, %v853_v4 }
 0x23a   : > { %871 = vst.msk [vmem:[%s312_s23 + $0x4] sm:$0xf] %vm869_vm6, %v1029_v5 }
 0x23b   : > { %870 = vst.msk [vmem:[%s312_s23] sm:$0xf] %vm869_vm6, %v1028_v6 }
 0x23c PF: > { %s17_s24 = sadd.s32 1, %s1167_s24  }
 0x23d   : > { %p14_p4 = scmp.ge.s32.totalorder %s17_s24, 4  }
 0x23f   :  { %16 = sbr.rel (!%p14_p4) target bundleno = 1 (0x1), region = 91 }

</bundles_post_ra>
